<compile_context>
chip_gen: v6e
topology: v6e:2x2x1
jax: 0.10.0
libtpu: 0.0.40
codegen_flags: <defaults>
</compile_context>

<pallas_src>
import numpy as np

import jax
import jax.numpy as jnp
from jax import lax
from jax.experimental import pallas as pl
from jax.experimental.pallas import tpu as pltpu


_LANE = 128          # TPU lane width: the batch axis rides lanes inside the kernel
_TILE_B_MAX = 2048   # batch rows per grid step (2048x32 f32 tile = 256 KiB, far below VMEM)


def _apply_act(h, s):
    r = jnp.maximum(h, 0.0)
    if s == 1:
        return r
    if s == 2:
        return r * r
    return r ** s  # s is a static Python int -> integer_pow (a few VPU muls)


def _make_mlp_kernel(n_layers: int, s: int, input_is_scalar: bool, use_bias: bool):
    """Whole-MLP forward for one batch tile; activations are [features, TILE_B]."""

    def kernel(*refs):
        # refs = (x_ref, w0_ref, ..., w{L-1}_ref, [b_ref], o_ref)
        x_ref = refs[0]
        w_refs = refs[1:1 + n_layers]
        b_ref = refs[1 + n_layers] if use_bias else None
        o_ref = refs[-1]

        x = x_ref[...].astype(jnp.float32)

        if n_layers == 1:
            if input_is_scalar:
                # x: [1, B], w: [1, 1] -> VPU broadcast multiply.
                out = x * w_refs[0][...]
            else:
                # x: [B, in], w: [1, in] -> W @ x^T without materializing x^T.
                out = lax.dot_general(
                    w_refs[0][...], x,
                    dimension_numbers=(((1,), (1,)), ((), ())),
                    preferred_element_type=jnp.float32)            # [1, B]
            out = out + b_ref[0]                                    # SMEM scalar bias
            o_ref[...] = out.astype(o_ref.dtype)
            return

        # ---- hidden layers (scale_cnst folded into weights 1..L-1) ----
        if input_is_scalar:
            # K == 1 matmul would waste an MXU pass: outer product on the VPU.
            h = w_refs[0][...] * x                                  # [hid, B]
        else:
            h = lax.dot_general(
                w_refs[0][...], x,
                dimension_numbers=(((1,), (1,)), ((), ())),
                preferred_element_type=jnp.float32)                 # [hid, B]
        h = _apply_act(h, s)

        for i in range(1, n_layers - 1):
            h = jnp.dot(w_refs[i][...], h,
                        preferred_element_type=jnp.float32)         # [hid, B], N = TILE_B lane-dense
            h = _apply_act(h, s)

        # Final width-1 layer: [hid, 1] weight column -> VPU multiply + sublane
        # reduce; the store is a lane-dense [1, B] row (unmasked vst).
        w_col = w_refs[-1][...]
        out = jnp.sum(h * w_col, axis=0, keepdims=True)             # [1, B]
        o_ref[...] = out.astype(o_ref.dtype)

    return kernel


class PallasMLP:
    """JAX/Pallas port of the PyTorch `Model` module."""

    def __init__(self, input_size=1, hidden_size=2, n_layers=1, p=0.0, seed=42, s=1):
        # TODO(synk): dropout is identity; only matches PyTorch for p == 0.0 or eval mode.
        del p
        self.n_layers = n_layers
        self.s = s
        self.input_size = input_size
        c_sigma = 2.0 / np.prod([2 * k + 1 for k in range(s)])
        self.scale_cnst = float(np.sqrt(c_sigma))

        key = jax.random.PRNGKey(seed)

        # Reference (un-folded) parameters in torch layout W:[out, in].
        # TODO(synk): PyTorch RNG / nn.Linear default init not reproduced bitwise;
        # deterministic JAX init with matching distributions instead.
        self.ref_weights = []
        self.ref_bias = None

        if n_layers == 1:
            kw, kb = jax.random.split(key)
            bound = 1.0 / np.sqrt(input_size)
            w = jax.random.uniform(kw, (1, input_size), jnp.float32, -bound, bound)
            b = jax.random.uniform(kb, (1,), jnp.float32, -bound, bound)
            self.ref_weights.append(w)
            self.ref_bias = b
        else:
            sizes = [input_size] + [hidden_size] * (n_layers - 1) + [1]
            std = float(np.sqrt(1.0 / hidden_size))
            for i in range(n_layers):
                key, sub = jax.random.split(key)
                w = std * jax.random.normal(sub, (sizes[i + 1], sizes[i]), jnp.float32)
                self.ref_weights.append(w)

        # Kernel parameters: torch-layout [out, in] weights with scale_cnst folded
        # into every weight after the first (exact: next op is linear).  The last
        # (width-1) weight is stored as a [hidden, 1] column for the sublane reduce.
        if n_layers == 1:
            self.kernel_weights = [jnp.asarray(self.ref_weights[0], jnp.float32)]
            self.kernel_bias = self.ref_bias
        else:
            kws = [jnp.asarray(self.ref_weights[0], jnp.float32)]
            for i in range(1, n_layers - 1):
                kws.append(jnp.asarray(self.scale_cnst * self.ref_weights[i], jnp.float32))
            kws.append(jnp.asarray((self.scale_cnst * self.ref_weights[-1]).T, jnp.float32))
            self.kernel_weights = kws
            self.kernel_bias = None

        self._fwd_cache = {}  # batch -> jitted forward (pallas_call built once)

    # ------------------------------------------------------------------ #

    @staticmethod
    def _pick_tile(batch: int):
        """Lane-aligned batch tile; >= 2 grid steps when possible (v7x megacore)."""
        if batch <= _LANE:
            return batch, 1                       # single full-extent block
        half = (batch + 1) // 2
        tile_b = min(_TILE_B_MAX, max(_LANE, (half // _LANE) * _LANE))
        return tile_b, pl.cdiv(batch, tile_b)     # last block may be ragged

    def _build_forward(self, batch: int):
        n_layers, s, input_size = self.n_layers, self.s, self.input_size
        input_is_scalar = (input_size == 1)
        use_bias = self.kernel_bias is not None

        tile_b, grid_b = self._pick_tile(batch)

        kernel = _make_mlp_kernel(n_layers, s, input_is_scalar, use_bias)

        if input_is_scalar:
            # x fed as a [1, batch] row (free reshape in the wrapper).
            x_spec = pl.BlockSpec((1, tile_b), lambda i: (0, i))
        else:
            # x fed un-transposed [batch, input_size]; batch tiled on sublanes.
            x_spec = pl.BlockSpec((tile_b, input_size), lambda i: (i, 0))

        in_specs = [x_spec]
        for w in self.kernel_weights:
            # Tiny weights, constant block index -> fetched once, resident in VMEM.
            in_specs.append(pl.BlockSpec(w.shape, lambda i: (0, 0)))
        if use_bias:
            in_specs.append(pl.BlockSpec(memory_space=pltpu.MemorySpace.SMEM))

        # Lane-dense output row; tile_b is a multiple of 128 (or the full extent).
        out_specs = pl.BlockSpec((1, tile_b), lambda i: (0, i))

        call = pl.pallas_call(
            kernel,
            out_shape=jax.ShapeDtypeStruct((1, batch), jnp.float32),
            grid=(grid_b,),
            in_specs=in_specs,
            out_specs=out_specs,
            compiler_params=pltpu.CompilerParams(
                dimension_semantics=("parallel",)),
        )

        @jax.jit
        def fwd(x, *params):
            xp = x.astype(jnp.float32)
            if input_is_scalar:
                xp = xp.reshape(1, batch)      # free relayout of the [B, 1] column
            out = call(xp, *params)            # [1, batch]
            return out.reshape(batch, 1)

        return fwd

    def __call__(self, x):
        batch = x.shape[0]
        fwd = self._fwd_cache.get(batch)
        if fwd is None:
            fwd = self._build_forward(batch)
            self._fwd_cache[batch] = fwd
        params = list(self.kernel_weights)
        if self.kernel_bias is not None:
            params.append(self.kernel_bias)
        return fwd(x, *params)


def _reference_forward(model: PallasMLP, x):
    """Pure-JAX reference mirroring the PyTorch forward (un-folded weights)."""
    h = jnp.asarray(x, jnp.float32)
    for i in range(model.n_layers - 1):
        h = h @ model.ref_weights[i].T
        h = model.scale_cnst * jnp.maximum(h, 0.0) ** model.s
    h = h @ model.ref_weights[-1].T
    if model.ref_bias is not None:
        h = h + model.ref_bias[None, :]
    return h


if __name__ == "__main__":
    # 1) 3-layer MLP, input=32, hidden=32, s=2 : exercises the transposed
    #    dot_general first layer + MXU hidden layer + sublane-reduce output.
    model = PallasMLP(input_size=32, hidden_size=32, n_layers=3, p=0.0, seed=42, s=2)
    x = jax.random.normal(jax.random.PRNGKey(0), (8, 32), jnp.float32)
    out = jax.block_until_ready(model(x))
    ref = _reference_forward(model, x)
    np.testing.assert_allclose(np.asarray(out), np.asarray(ref), rtol=1e-5, atol=1e-5)
    assert out.shape == (8, 1)

    # 2) Module-default widths (input_size=1, hidden=2), 2 layers, batch=200:
    #    VPU outer-product first layer, 2-step parallel grid, ragged last block.
    model2 = PallasMLP(input_size=1, hidden_size=2, n_layers=2, p=0.0, seed=3, s=1)
    x2 = jax.random.normal(jax.random.PRNGKey(1), (200, 1), jnp.float32)
    out2 = jax.block_until_ready(model2(x2))
    ref2 = _reference_forward(model2, x2)
    np.testing.assert_allclose(np.asarray(out2), np.asarray(ref2), rtol=1e-5, atol=1e-5)
    assert out2.shape == (200, 1)

    # 3) n_layers == 1: single Linear with SMEM scalar bias.
    model1 = PallasMLP(input_size=4, hidden_size=2, n_layers=1, p=0.0, seed=7, s=1)
    x1 = jax.random.normal(jax.random.PRNGKey(2), (5, 4), jnp.float32)
    out1 = jax.block_until_ready(model1(x1))
    ref1 = _reference_forward(model1, x1)
    np.testing.assert_allclose(np.asarray(out1), np.asarray(ref1), rtol=1e-5, atol=1e-5)
    assert out1.shape == (5, 1)

    print("KERNEL_OK")
</pallas_src>

<mosaic_0001>
module attributes {stable_mosaic.version = 11 : i64} {
  func.func @kernel(%arg0: i32, %arg1: memref<8x32xf32, #tpu.memory_space<vmem>>, %arg2: memref<32x32xf32, #tpu.memory_space<vmem>>, %arg3: memref<32x32xf32, #tpu.memory_space<vmem>>, %arg4: memref<32x1xf32, #tpu.memory_space<vmem>>, %arg5: memref<1x8xf32, #tpu.memory_space<vmem>>) attributes {dimension_semantics = [#tpu.dimension_semantics<parallel>], iteration_bounds = array<i64: 1>, scalar_prefetch = 0 : i64, scratch_operands = 0 : i64, tpu.core_type = #tpu.core_type<tc>, window_params = [{transform_indices = @transform_0, window_bounds = array<i64: 8, 32>}, {pipeline_mode = #tpu.pipeline_mode<synchronous>, transform_indices = @transform_1, window_bounds = array<i64: 32, 32>}, {pipeline_mode = #tpu.pipeline_mode<synchronous>, transform_indices = @transform_2, window_bounds = array<i64: 32, 32>}, {pipeline_mode = #tpu.pipeline_mode<synchronous>, transform_indices = @transform_3, window_bounds = array<i64: 32, 1>}, {transform_indices = @transform_4, window_bounds = array<i64: 1, 8>}]} {
    %c0 = arith.constant 0 : index
    %c0_0 = arith.constant 0 : index
    %0 = vector.load %arg1[%c0, %c0_0] : memref<8x32xf32, #tpu.memory_space<vmem>>, vector<8x32xf32>
    %c0_1 = arith.constant 0 : index
    %c0_2 = arith.constant 0 : index
    %1 = vector.load %arg2[%c0_1, %c0_2] : memref<32x32xf32, #tpu.memory_space<vmem>>, vector<32x32xf32>
    %cst = arith.constant dense<0.000000e+00> : vector<32x8xf32>
    %2 = tpu.matmul %1, %0, %cst {dimension_numbers = #tpu.dot_dimension_numbers<[1], [1], [0], [0], [0, 0, 1, 0], [], []>} : vector<32x32xf32>, vector<8x32xf32>, vector<32x8xf32> -> vector<32x8xf32>
    %cst_3 = arith.constant 0.000000e+00 : f32
    %3 = vector.broadcast %cst_3 : f32 to vector<32x8xf32>
    %4 = arith.maximumf %2, %3 : vector<32x8xf32>
    %5 = arith.mulf %4, %4 : vector<32x8xf32>
    %c0_4 = arith.constant 0 : index
    %c0_5 = arith.constant 0 : index
    %6 = vector.load %arg3[%c0_4, %c0_5] : memref<32x32xf32, #tpu.memory_space<vmem>>, vector<32x32xf32>
    %cst_6 = arith.constant dense<0.000000e+00> : vector<32x8xf32>
    %7 = tpu.matmul %6, %5, %cst_6 {dimension_numbers = #tpu.dot_dimension_numbers<[1], [0], [0], [1], [0, 0, 1, 1], [], []>} : vector<32x32xf32>, vector<32x8xf32>, vector<32x8xf32> -> vector<32x8xf32>
    %cst_7 = arith.constant 0.000000e+00 : f32
    %8 = vector.broadcast %cst_7 : f32 to vector<32x8xf32>
    %9 = arith.maximumf %7, %8 : vector<32x8xf32>
    %10 = arith.mulf %9, %9 : vector<32x8xf32>
    %c0_8 = arith.constant 0 : index
    %c0_9 = arith.constant 0 : index
    %11 = vector.load %arg4[%c0_8, %c0_9] : memref<32x1xf32, #tpu.memory_space<vmem>>, vector<32x1xf32>
    %12 = vector.broadcast %11 : vector<32x1xf32> to vector<32x8xf32>
    %13 = arith.mulf %10, %12 : vector<32x8xf32>
    %cst_10 = arith.constant dense<0.000000e+00> : vector<8xf32>
    %14 = vector.multi_reduction <add>, %13, %cst_10 [0] : vector<32x8xf32> to vector<8xf32>
    %15 = vector.shape_cast %14 : vector<8xf32> to vector<1x8xf32>
    %c0_11 = arith.constant 0 : index
    %c0_12 = arith.constant 0 : index
    %16 = vector.load %arg5[%c0_11, %c0_12] : memref<1x8xf32, #tpu.memory_space<vmem>>, vector<1x8xf32>
    tpu.vector_store %arg5[%c0_11, %c0_12], %15 {strides = array<i32>} : memref<1x8xf32, #tpu.memory_space<vmem>>, vector<1x8xf32>,
    return
  }
  func.func @transform_0(%arg0: i32) -> (i32, i32) {
    %c0_i32 = arith.constant 0 : i32
    %c0_i32_0 = arith.constant 0 : i32
    return %arg0, %c0_i32 : i32, i32
  }
  func.func @transform_1(%arg0: i32) -> (i32, i32) {
    %c0_i32 = arith.constant 0 : i32
    %c0_i32_0 = arith.constant 0 : i32
    %c0_i32_1 = arith.constant 0 : i32
    return %c0_i32, %c0_i32_0 : i32, i32
  }
  func.func @transform_2(%arg0: i32) -> (i32, i32) {
    %c0_i32 = arith.constant 0 : i32
    %c0_i32_0 = arith.constant 0 : i32
    %c0_i32_1 = arith.constant 0 : i32
    return %c0_i32, %c0_i32_0 : i32, i32
  }
  func.func @transform_3(%arg0: i32) -> (i32, i32) {
    %c0_i32 = arith.constant 0 : i32
    %c0_i32_0 = arith.constant 0 : i32
    %c0_i32_1 = arith.constant 0 : i32
    return %c0_i32, %c0_i32_0 : i32, i32
  }
  func.func @transform_4(%arg0: i32) -> (i32, i32) {
    %c0_i32 = arith.constant 0 : i32
    %c0_i32_0 = arith.constant 0 : i32
    return %c0_i32, %arg0 : i32, i32
  }
}

</mosaic_0001>

<bundles_post_ra>
// kernel: fwd.1
= control target key start
LH: loop header
LB: loop body
LE: loop exit
PB: predicated region body
PF: predicated region fallthrough
CT: control target
= control target key end

     0   :  { %9 = vsyncpa [#allocation3], 0  ;;  %s519_s0 = inlined_call_operand.hbm [shape: f32[8,32], index: 0, kind: input, shape index: {}]   ;;  %s520_s1 = inlined_call_operand.vmem [shape: f32[32,32], index: 1, kind: input, shape index: {}]   ;;  %s521_s2 = inlined_call_operand.hbm [shape: f32[32,32], index: 2, kind: input, shape index: {}]   ;;  %s522_s3 = inlined_call_operand.vmem [shape: f32[32,1], index: 3, kind: input, shape index: {}]   ;;  %s523_s4 = inlined_call_operand.hbm [shape: f32[1,8], index: 4, kind: output, shape index: {}]  }
   0x1   :  { %10 = vsyncpa [#allocation6], 0 }
   0x2   :  { %11 = vsyncpa [#allocation4], 0  ;;  %s445_s15 = smov [#allocation2]   ;;  %s446_s17 = smov [#allocation5]  }
   0x3   :  { %s18_s16 = sshll.u32 %s445_s15, 4  ;;  %s29_s18 = sshll.u32 %s446_s17, 4  ;;  %s19_s16 = int_to_ptr.vmem [resolvable:$true] %s18_s16  ;;  %s30_s18 = int_to_ptr.vmem [resolvable:$true] %s29_s18 }
   0x4   :  { %s387_s19 = scalar_lea.vmem %s19_s16, 128  ;;  %p392_p1 = scmp.lt.s32.totalorder %s19_s16, %s19_s16 }
   0x5   :  { %p388_p0 = scmp.ne.s32.totalorder %s19_s16, %s387_s19  ;;  %p393_p2 = scmp.lt.s32.totalorder %s387_s19, %s387_s19 }
   0x7   :  { %p394_p3 = por %p393_p2, %p392_p1 }
   0x9   :  { %p395_p4 = pnand %p394_p3, %p388_p0 }
   0xb   :  { %398 = shalt.err (!%p395_p4)
}
   0xc   :  { %21 = dma.hbm_to_vmem [thread:$0]  %s519_s0, 128, %s19_s16, [#allocation3]  }
   0xd   :  { %s407_s22 = scalar_lea.vmem %s30_s18, 512  ;;  %p412_p6 = scmp.lt.s32.totalorder %s30_s18, %s30_s18 }
   0xe   :  { %p408_p5 = scmp.ne.s32.totalorder %s30_s18, %s407_s22  ;;  %p413_p7 = scmp.lt.s32.totalorder %s407_s22, %s407_s22 }
  0x10   :  { %p414_p8 = por %p413_p7, %p412_p6 }
  0x12   :  { %p415_p9 = pnand %p414_p8, %p408_p5 }
  0x14   :  { %418 = shalt.err (!%p415_p9)
}
  0x15   :  { %s447_s23 = smov 128   ;;  %s448_s24 = smov 8  }
  0x16   :  { %35 = dma.hbm_to_vmem [thread:$0]  %s521_s2, 512, %s30_s18, [#allocation6], %s447_s23, %s447_s23, %s448_s24  }
  0x17   :  { %439 = dma.done.wait [#allocation3], 128  }
  0x18   :  { %440 = vsyncadd [#allocation3], 4294967168 }
  0x19   :  { %441 = dma.done.wait [#allocation6], 512  }
  0x1a   :  { %442 = vsyncadd [#allocation6], 4294966784  ;;  %vm49_vm0 = vcmask 261120   ;;  %v44_v0 = vld [vmem:[#allocation2] sm:$0xff]  ;;  %v46_v2 = vld [vmem:[%s520_s1 + $0x8] sm:$0xff]  ;;  %v449_v8 = vmov 0  }
  0x1b   :  { %v45_v1 = vld [vmem:[%s520_s1] sm:$0xff]  ;;  %349 = vmatprep.subr.msk.mxu0 %vm49_vm0, %v44_v0  ;;  %v47_v3 = vld [vmem:[%s520_s1 + $0x10] sm:$0xff]  ;;  %v48_v4 = vld [vmem:[%s520_s1 + $0x18] sm:$0xff]  ;;  %377 = vset.pattern.permute.xlu0 %v449_v8  ;;  %vm295_vm1 = vcmask 64512   ;;  %vm309_vm2 = vcmask 57344  }
  0x1c   :  { %351 = vmatprep.mubr.msk.f32.mxu0 %vm49_vm0, %v45_v1  ;;  %350 = vmatpush3.xpose.msk.msra.mxu0 %vm49_vm0, %v44_v0  ;;  %v158_v5 = vld [vmem:[#allocation5] sm:$0xff]  ;;  %v267_v6 = vld [vmem:[%s522_s3] sm:$0xff]  ;;  %v269_v7 = vld [vmem:[%s522_s3 + $0x10] sm:$0xff] }
  0x1d   :  { %365 = vmatprep.mubr.msk.f32.mxu1 %vm49_vm0, %v158_v5  ;;  %378 = vset.pattern.permute.xlu1 %v449_v8  ;;  %v268_v9 = vld [vmem:[%s522_s3 + $0x8] sm:$0xff]  ;;  %v270_v10 = vld [vmem:[%s522_s3 + $0x18] sm:$0xff]  ;;  %v159_v23 = vld [vmem:[#allocation5 + $0x8] sm:$0xff]  ;;  %s450_s3 = smov [#allocation7]  }
  0x1e   :  { %273 = vperm.xlu0 %377, %v267_v6   ;;  %283 = vperm.xlu1 %378, %v269_v7   ;;  %v160_v24 = vld [vmem:[#allocation5 + $0x10] sm:$0xff]  ;;  %v161_v25 = vld [vmem:[#allocation5 + $0x18] sm:$0xff]  ;;  %s317_s14 = sshll.u32 %s450_s3, 4  ;;  %s318_s14 = int_to_ptr.vmem [resolvable:$true] %s317_s14 }
  0x1f   :  { %352 = vmatmul.mubr.msk.f32.vlgmr.msra.gmra.mxu0 %vm49_vm0, %v46_v2  ;;  %s419_s15 = scalar_lea.vmem %s318_s14, 16  ;;  %s423_s16 = scalar_lea.vmem %s318_s14, 32 }
  0x20   :  { %354 = vmatprep.mubr.msk.f32.mxu0 %vm49_vm0, %v47_v3  ;;  %p420_p10 = scmp.ne.s32.totalorder %s318_s14, %s419_s15  ;;  %p424_p11 = scmp.lt.s32.totalorder %s318_s14, %s318_s14 }
  0x21   :  { %p425_p12 = scmp.lt.s32.totalorder %s423_s16, %s419_s15 }
  0x22   :  { %278 = vperm.xlu0 %377, %v268_v9   ;;  %288 = vperm.xlu1 %378, %v270_v10  }
  0x23   :  { %355 = vmatmul.mubr.msk.f32.gmra.mxu0 %vm49_vm0, %v48_v4  ;;  %p426_p13 = por %p425_p12, %p424_p11 }
  0x25   :  { %p427_p0 = pnand %p426_p13, %p420_p10 }
  0x99   :  { %v274_v26 = vpop.permute.xlu0 %273  ;;  %v284_v30 = vpop.permute.xlu1 %283 }
  0x9d   :  { %v279_v33 = vpop.permute.xlu0 %278  ;;  %v289_v42 = vpop.permute.xlu1 %288 }
  0xdf   :  { %v353_v11 = vpop.f32.mrf.mxu0 }
  0xe0   :  { %v151_v16 = vmax.f32 %v353_v11, 0.0 }
  0xe1   :  { %v131_v12 = vpop.f32.mrf.mxu0 }
  0xe2   :  { %v150_v19 = vmax.f32 %v131_v12, 0.0  ;;  %v155_v21 = vmul.f32 %v151_v16, %v151_v16 }
  0xe3   :  { %v356_v13 = vpop.f32.mrf.mxu0 }
  0xe4   :  { %v153_v14 = vmax.f32 %v356_v13, 0.0  ;;  %v154_v22 = vmul.f32 %v150_v19, %v150_v19 }
  0xe5   :  { %v141_v15 = vpop.f32.mrf.mxu0 }
  0xe6   :  { %v157_v17 = vmul.f32 %v153_v14, %v153_v14  ;;  %v152_v18 = vmax.f32 %v141_v15, 0.0 }
  0xe8   :  { %v156_v20 = vmul.f32 %v152_v18, %v152_v18  ;;  %357 = vmatprep.subr.mxu1 %v157_v17 }
  0xe9   :  { %358 = vmatpush3.msra.mxu1 %v157_v17 }
  0xea   :  { %359 = vmatprep.subr.mxu1 %v156_v20 }
  0xeb   :  { %360 = vmatpush3.msra.mxu1 %v156_v20 }
  0xec   :  { %361 = vmatprep.subr.mxu1 %v155_v21 }
  0xed   :  { %362 = vmatpush3.msra.mxu1 %v155_v21 }
  0xee   :  { %363 = vmatprep.subr.mxu1 %v154_v22 }
  0xef   :  { %364 = vmatpush3.msra.mxu1 %v154_v22 }
  0xf0   :  { %366 = vmatmul.mubr.msk.f32.vlgmr.msra.gmra.mxu1 %vm49_vm0, %v159_v23 }
  0xf1   :  { %368 = vmatprep.mubr.msk.f32.mxu1 %vm49_vm0, %v160_v24 }
  0xf4   :  { %369 = vmatmul.mubr.msk.f32.gmra.mxu1 %vm49_vm0, %v161_v25 }
 0x1b0   :  { %v367_v27 = vpop.f32.mrf.mxu1 }
 0x1b1   :  { %v260_v28 = vmax.f32 %v367_v27, 0.0 }
 0x1b2   :  { %v240_v29 = vpop.f32.mrf.mxu1 }
 0x1b3   :  { %v264_v31 = vmul.f32 %v260_v28, %v260_v28  ;;  %v259_v32 = vmax.f32 %v240_v29, 0.0 }
 0x1b4   :  { %v370_v34 = vpop.f32.mrf.mxu1 }
 0x1b5   :  { %v263_v35 = vmul.f32 %v259_v32, %v259_v32  ;;  %v262_v36 = vmax.f32 %v370_v34, 0.0  ;;  %v292_v39 = vmul.f32 %v279_v33, %v264_v31 }
 0x1b6   :  { %v250_v37 = vpop.f32.mrf.mxu1 }
 0x1b7   :  { %v291_v38 = vmul.f32 %v274_v26, %v263_v35  ;;  %v266_v40 = vmul.f32 %v262_v36, %v262_v36  ;;  %v261_v41 = vmax.f32 %v250_v37, 0.0  ;;  %v297_v45 = vsel %vm295_vm1, %v292_v39, 0.0 }
 0x1b9   :  { %v296_v43 = vsel %vm295_vm1, %v291_v38, 0.0  ;;  %v265_v44 = vmul.f32 %v261_v41, %v261_v41  ;;  %v294_v47 = vmul.f32 %v289_v42, %v266_v40 }
 0x1ba   :  { %v298_v48 = vadd.f32 %v297_v45, %v296_v43 }
 0x1bb   :  { %v293_v46 = vmul.f32 %v284_v30, %v265_v44  ;;  %v301_v51 = vsel %vm295_vm1, %v294_v47, 0.0 }
 0x1bd   :  { %v299_v49 = vsel %vm295_vm1, %v293_v46, 0.0 }
 0x1be   :  { %v300_v50 = vadd.f32 %v299_v49, %v298_v48 }
 0x1c0   :  { %v302_v52 = vadd.f32 %v301_v51, %v300_v50 }
 0x1c2   :  { %v303_v53 = vrot.slane %v302_v52, 4 }
 0x1c4   :  { %v304_v54 = vadd.f32 %v303_v53, %v302_v52 }
 0x1c6   :  { %v305_v55 = vrot.slane %v304_v54, 2 }
 0x1c8   :  { %v306_v56 = vadd.f32 %v305_v55, %v304_v54 }
 0x1ca   :  { %v307_v57 = vrot.slane %v306_v56, 1 }
 0x1cc   :  { %v308_v58 = vadd.f32 %v307_v57, %v306_v56 }
 0x1ce   :  { %310 = vst.msk [vmem:[#allocation7] sm:$0x1] %vm309_vm2, %v308_v58 }
 0x1cf   :  { %430 = shalt.err (!%p427_p0)
}
 0x1d0   :  { %320 = dma.vmem_to_hbm [thread:$0]  %s318_s14, 16, %s523_s4, [#allocation4]  }
 0x1d1   :  { %443 = dma.done.wait [#allocation4], 16  }
 0x1d2   :  { %444 = vsyncadd [#allocation4], 4294967280 }
 0x1d3   :  { %324 = vsyncpa [#allocation3], 1 }
 0x1d4   :  { %325 = vsyncpa [#allocation6], 1 }
 0x1d5   :  { %326 = vsyncpa [#allocation4], 1 }

</bundles_post_ra>
